<compile_context>
chip_gen: v7x
topology: tpu7x:2x2x1
jax: 0.10.0
libtpu: 0.0.40
codegen_flags: <defaults>
</compile_context>

<pallas_src>
import functools

import jax
import jax.numpy as jnp
from jax.experimental import pallas as pl
from jax.experimental.pallas import tpu as pltpu

EPS = 1e-5
LANE = 128
SUBLANE_BF16 = 16


def _mlp_kernel(x_ref, w1_ref, w23_ref, p_ref, out_ref, *, h1, h2, inv_b):
    # p_ref layout (f32): row 0 = linear bias, row 1 = BN gamma, row 2 = BN beta.
    # Columns [0:h1] -> layer 1, [h1:h1+h2] -> layer 2, [h1+h2:] -> final bias.
    # All slice offsets/widths are static multiples of 128 -> free lane-aligned views.

    def bn_train(h, off, width):
        # Two-pass (centered) batch stats: biased variance, training-mode BatchNorm1d.
        mean = jnp.sum(h, axis=0, keepdims=True) * inv_b
        c = h - mean
        var = jnp.sum(c * c, axis=0, keepdims=True) * inv_b
        scale = jax.lax.rsqrt(var + EPS) * p_ref[1:2, off:off + width]
        return c * scale + p_ref[2:3, off:off + width]

    # Layer 1: Linear (bf16 MXU inputs, f32 accumulation) -> ReLU -> BatchNorm1d.
    x = x_ref[...].astype(jnp.bfloat16)
    h = jnp.dot(x, w1_ref[...], preferred_element_type=jnp.float32) + p_ref[0:1, 0:h1]
    h = bn_train(jnp.maximum(h, 0.0), 0, h1)

    # Layer 2: Linear -> ReLU -> BatchNorm1d (w2 is the first h2 lanes of w23).
    h = jnp.dot(h.astype(jnp.bfloat16), w23_ref[:, 0:h2],
                preferred_element_type=jnp.float32) + p_ref[0:1, h1:h1 + h2]
    h = bn_train(jnp.maximum(h, 0.0), h1, h2)

    # Output Linear (lane-padded to 128 columns -> unmasked lane-dense store).
    out = jnp.dot(h.astype(jnp.bfloat16), w23_ref[:, h2:],
                  preferred_element_type=jnp.float32) + p_ref[0:1, h1 + h2:]
    out_ref[...] = out.astype(out_ref.dtype)


def mlp_forward_batched(xs, kernel_params):
    """xs: (G, B, in) f32 — G independent mini-batches, each normalized with its own
    BatchNorm batch statistics (== G separate MLP.forward calls).  Weights are DMA'd
    into VMEM once (constant index_map) and reused across the grid."""
    w1p, w23, p, dims = kernel_params
    G, B, in_dim = xs.shape
    assert in_dim == dims["in_dim"], "input feature size mismatch"
    k_pad, h1, h2, n_pad = dims["k_pad"], dims["h1"], dims["h2"], dims["n_pad"]

    # Zero-pad the layer-1 contraction dim (zeros don't change the dot product).
    xs_pad = jnp.pad(xs, ((0, 0), (0, 0), (0, k_pad - in_dim)))

    # NOTE: inv_b is baked at trace time from the (static) batch size B.
    kernel = functools.partial(_mlp_kernel, h1=h1, h2=h2, inv_b=1.0 / B)

    out_padded = pl.pallas_call(
        kernel,
        out_shape=jax.ShapeDtypeStruct((G, B, n_pad), jnp.float32),
        grid=(G,),
        in_specs=[
            pl.BlockSpec((None, B, k_pad), lambda g: (g, 0, 0)),        # activations
            pl.BlockSpec((k_pad, h1), lambda g: (0, 0)),                 # w1 (resident)
            pl.BlockSpec((h1, h2 + n_pad), lambda g: (0, 0)),            # w2|w3 (resident)
            pl.BlockSpec((3, h1 + h2 + n_pad), lambda g: (0, 0)),        # bias/gamma/beta
        ],
        out_specs=pl.BlockSpec((None, B, n_pad), lambda g: (g, 0, 0)),
        compiler_params=pltpu.CompilerParams(
            dimension_semantics=("parallel",)),  # v7x: shard mini-batches across TCs
    )(xs_pad, w1p, w23, p)

    return out_padded[..., :dims["out_dim"]]


def mlp_forward(x, kernel_params):
    """Single forward matching MLP.forward: x (B, in) f32 -> (B, out_dim) f32."""
    return mlp_forward_batched(x[None], kernel_params)[0]


def init_params(key, input_size=50, hidden_sizes=(512, 512), output_size=10):
    """Deterministic init mimicking nn.Linear (uniform +-1/sqrt(fan_in)) and
    nn.BatchNorm1d (gamma=1, beta=0). Weights stored as (in, out), f32."""
    params = []
    sizes = [input_size] + list(hidden_sizes)
    keys = jax.random.split(key, len(hidden_sizes) + 1)
    for li, (fin, fout) in enumerate(zip(sizes[:-1], sizes[1:])):
        kw, kb = jax.random.split(keys[li])
        bound = 1.0 / jnp.sqrt(fin)
        w = jax.random.uniform(kw, (fin, fout), jnp.float32, -bound, bound)
        b = jax.random.uniform(kb, (1, fout), jnp.float32, -bound, bound)
        g = jnp.ones((1, fout), jnp.float32)     # BatchNorm gamma
        be = jnp.zeros((1, fout), jnp.float32)   # BatchNorm beta
        params += [w, b, g, be]
    fin = sizes[-1]
    kw, kb = jax.random.split(keys[-1])
    bound = 1.0 / jnp.sqrt(fin)
    w3 = jax.random.uniform(kw, (fin, output_size), jnp.float32, -bound, bound)
    b3 = jax.random.uniform(kb, (1, output_size), jnp.float32, -bound, bound)
    params += [w3, b3]
    return tuple(params)


def pack_params(raw_params, lane_pad=LANE):
    """Kernel layout: bf16 weights (w1 K-padded to the bf16 sublane tile, w2|w3 fused,
    w3/bias lane-padded to a multiple of 128) and one packed (3, h1+h2+n_pad) f32
    [bias; gamma; beta] buffer -> 4 input DMAs total."""
    (w1, b1, g1, be1, w2, b2, g2, be2, w3, b3) = raw_params
    in_dim, h1 = w1.shape
    h2 = w2.shape[1]
    out_dim = w3.shape[1]
    assert w2.shape[0] == h1 and w3.shape[0] == h2
    assert h1 == h2, "fused w2|w3 buffer assumes equal hidden sizes (module default)"
    assert h1 % lane_pad == 0 and h2 % lane_pad == 0, "hidden sizes must be lane-aligned"

    # Pad layer-1 contraction dim 50 -> 64 (bf16 sublane tile) for an exact layout.
    k_pad = ((in_dim + SUBLANE_BF16 - 1) // SUBLANE_BF16) * SUBLANE_BF16
    w1p = jnp.pad(w1, ((0, k_pad - in_dim), (0, 0))).astype(jnp.bfloat16)

    # Pad final layer output dim to a full 128-lane tile; fuse w2 and w3 into one buffer.
    n_pad = ((out_dim + lane_pad - 1) // lane_pad) * lane_pad
    w3p = jnp.pad(w3, ((0, 0), (0, n_pad - out_dim)))
    b3p = jnp.pad(b3, ((0, 0), (0, n_pad - out_dim)))
    w23 = jnp.concatenate([w2, w3p], axis=1).astype(jnp.bfloat16)     # (h1, h2 + n_pad)

    p1 = jnp.concatenate([b1, g1, be1], axis=0)                                    # (3, h1)
    p2 = jnp.concatenate([b2, g2, be2], axis=0)                                    # (3, h2)
    p3 = jnp.concatenate([b3p, jnp.zeros((2, n_pad), jnp.float32)], axis=0)        # (3, n_pad)
    p = jnp.concatenate([p1, p2, p3], axis=1).astype(jnp.float32)     # (3, h1+h2+n_pad)

    dims = dict(in_dim=in_dim, k_pad=k_pad, h1=h1, h2=h2, out_dim=out_dim, n_pad=n_pad)
    return (w1p, w23, p, dims)


def mlp_reference(x, raw_params):
    """Pure-JAX reference following the same numeric path (bf16 matmul inputs,
    f32 accumulation, training-mode BatchNorm with biased variance)."""
    (w1, b1, g1, be1, w2, b2, g2, be2, w3, b3) = raw_params

    def mm(a, w):
        return jnp.dot(a.astype(jnp.bfloat16), w.astype(jnp.bfloat16),
                       preferred_element_type=jnp.float32)

    def bn(h, g, be):
        mean = jnp.mean(h, axis=0, keepdims=True)
        var = jnp.mean((h - mean) ** 2, axis=0, keepdims=True)
        return (h - mean) * jax.lax.rsqrt(var + EPS) * g + be

    h = jnp.maximum(mm(x, w1) + b1, 0.0)
    h = bn(h, g1, be1)
    h = jnp.maximum(mm(h, w2) + b2, 0.0)
    h = bn(h, g2, be2)
    return mm(h, w3) + b3


if __name__ == "__main__":
    key = jax.random.PRNGKey(0)
    kx, kxs, kp = jax.random.split(key, 3)

    B, IN, HIDDEN, OUT = 8, 50, (512, 512), 10
    raw_params = init_params(kp, IN, HIDDEN, OUT)
    kparams = pack_params(raw_params)

    # Single forward, as in MLP.forward on a (B, 50) batch.
    x = jax.random.normal(kx, (B, IN), dtype=jnp.float32)
    out = jax.block_until_ready(mlp_forward(x, kparams))
    ref = mlp_reference(x, raw_params)
    assert out.shape == (B, OUT)
    assert bool(jnp.all(jnp.isfinite(out)))
    assert jnp.allclose(out, ref, atol=1e-2, rtol=1e-2), "single-batch mismatch vs reference"

    # Amortized path: 4 independent mini-batches in one pallas_call; weights are
    # DMA'd into VMEM once and reused across the grid.
    G = 4
    xs = jax.random.normal(kxs, (G, B, IN), dtype=jnp.float32)
    outs = jax.block_until_ready(mlp_forward_batched(xs, kparams))
    refs = jnp.stack([mlp_reference(xs[g], raw_params) for g in range(G)])
    assert outs.shape == (G, B, OUT)
    assert bool(jnp.all(jnp.isfinite(outs)))
    assert jnp.allclose(outs, refs, atol=1e-2, rtol=1e-2), "batched mismatch vs reference"

    print("KERNEL_OK")
</pallas_src>

<mosaic_0001>
module attributes {stable_mosaic.version = 11 : i64} {
  func.func @_mlp_kernel(%arg0: i32, %arg1: memref<1x8x64xf32, #tpu.memory_space<vmem>>, %arg2: memref<64x512xbf16, #tpu.memory_space<vmem>>, %arg3: memref<512x640xbf16, #tpu.memory_space<vmem>>, %arg4: memref<3x1152xf32, #tpu.memory_space<vmem>>, %arg5: memref<1x8x128xf32, #tpu.memory_space<vmem>>) attributes {dimension_semantics = [#tpu.dimension_semantics<parallel>], iteration_bounds = array<i64: 1>, scalar_prefetch = 0 : i64, scratch_operands = 0 : i64, tpu.core_type = #tpu.core_type<tc>, window_params = [{transform_indices = @transform_0, window_bounds = array<i64: 1, 8, 64>}, {pipeline_mode = #tpu.pipeline_mode<synchronous>, transform_indices = @transform_1, window_bounds = array<i64: 64, 512>}, {pipeline_mode = #tpu.pipeline_mode<synchronous>, transform_indices = @transform_2, window_bounds = array<i64: 512, 640>}, {pipeline_mode = #tpu.pipeline_mode<synchronous>, transform_indices = @transform_3, window_bounds = array<i64: 3, 1152>}, {transform_indices = @transform_4, window_bounds = array<i64: 1, 8, 128>}]} {
    %c0 = arith.constant 0 : index
    %c0_0 = arith.constant 0 : index
    %c0_1 = arith.constant 0 : index
    %0 = vector.load %arg1[%c0, %c0_0, %c0_1] : memref<1x8x64xf32, #tpu.memory_space<vmem>>, vector<1x8x64xf32>
    %1 = vector.shape_cast %0 : vector<1x8x64xf32> to vector<8x64xf32>
    %2 = arith.truncf %1 : vector<8x64xf32> to vector<8x64xbf16>
    %c0_2 = arith.constant 0 : index
    %c0_3 = arith.constant 0 : index
    %3 = vector.load %arg2[%c0_2, %c0_3] : memref<64x512xbf16, #tpu.memory_space<vmem>>, vector<64x512xbf16>
    %cst = arith.constant dense<0.000000e+00> : vector<8x512xf32>
    %4 = tpu.matmul %2, %3, %cst {dimension_numbers = #tpu.dot_dimension_numbers<[1], [0], [0], [1], [0, 0, 1, 1], [], []>} : vector<8x64xbf16>, vector<64x512xbf16>, vector<8x512xf32> -> vector<8x512xf32>
    %c0_4 = arith.constant 0 : index
    %c0_5 = arith.constant 0 : index
    %5 = vector.load %arg4[%c0_4, %c0_5] : memref<3x1152xf32, #tpu.memory_space<vmem>>, vector<1x512xf32>
    %6 = vector.broadcast %5 : vector<1x512xf32> to vector<8x512xf32>
    %7 = arith.addf %4, %6 : vector<8x512xf32>
    %cst_6 = arith.constant 0.000000e+00 : f32
    %8 = vector.broadcast %cst_6 : f32 to vector<8x512xf32>
    %9 = arith.maximumf %7, %8 : vector<8x512xf32>
    %cst_7 = arith.constant dense<0.000000e+00> : vector<512xf32>
    %10 = vector.multi_reduction <add>, %9, %cst_7 [0] : vector<8x512xf32> to vector<512xf32>
    %11 = vector.shape_cast %10 : vector<512xf32> to vector<1x512xf32>
    %cst_8 = arith.constant 1.250000e-01 : f32
    %12 = vector.broadcast %cst_8 : f32 to vector<1x512xf32>
    %13 = arith.mulf %11, %12 : vector<1x512xf32>
    %14 = vector.broadcast %13 : vector<1x512xf32> to vector<8x512xf32>
    %15 = arith.subf %9, %14 : vector<8x512xf32>
    %16 = arith.mulf %15, %15 : vector<8x512xf32>
    %cst_9 = arith.constant dense<0.000000e+00> : vector<512xf32>
    %17 = vector.multi_reduction <add>, %16, %cst_9 [0] : vector<8x512xf32> to vector<512xf32>
    %18 = vector.shape_cast %17 : vector<512xf32> to vector<1x512xf32>
    %cst_10 = arith.constant 1.250000e-01 : f32
    %19 = vector.broadcast %cst_10 : f32 to vector<1x512xf32>
    %20 = arith.mulf %18, %19 : vector<1x512xf32>
    %cst_11 = arith.constant 9.99999974E-6 : f32
    %21 = vector.broadcast %cst_11 : f32 to vector<1x512xf32>
    %22 = arith.addf %20, %21 : vector<1x512xf32>
    %23 = math.rsqrt %22 : vector<1x512xf32>
    %c1 = arith.constant 1 : index
    %c0_12 = arith.constant 0 : index
    %24 = vector.load %arg4[%c1, %c0_12] : memref<3x1152xf32, #tpu.memory_space<vmem>>, vector<1x512xf32>
    %25 = arith.mulf %23, %24 : vector<1x512xf32>
    %26 = vector.broadcast %25 : vector<1x512xf32> to vector<8x512xf32>
    %27 = arith.mulf %15, %26 : vector<8x512xf32>
    %c2 = arith.constant 2 : index
    %c0_13 = arith.constant 0 : index
    %28 = vector.load %arg4[%c2, %c0_13] : memref<3x1152xf32, #tpu.memory_space<vmem>>, vector<1x512xf32>
    %29 = vector.broadcast %28 : vector<1x512xf32> to vector<8x512xf32>
    %30 = arith.addf %27, %29 : vector<8x512xf32>
    %31 = arith.truncf %30 : vector<8x512xf32> to vector<8x512xbf16>
    %c0_14 = arith.constant 0 : index
    %c0_15 = arith.constant 0 : index
    %32 = vector.load %arg3[%c0_14, %c0_15] : memref<512x640xbf16, #tpu.memory_space<vmem>>, vector<512x512xbf16>
    %cst_16 = arith.constant dense<0.000000e+00> : vector<8x512xf32>
    %33 = tpu.matmul %31, %32, %cst_16 {dimension_numbers = #tpu.dot_dimension_numbers<[1], [0], [0], [1], [0, 0, 1, 1], [], []>} : vector<8x512xbf16>, vector<512x512xbf16>, vector<8x512xf32> -> vector<8x512xf32>
    %c0_17 = arith.constant 0 : index
    %c512 = arith.constant 512 : index
    %34 = vector.load %arg4[%c0_17, %c512] : memref<3x1152xf32, #tpu.memory_space<vmem>>, vector<1x512xf32>
    %35 = vector.broadcast %34 : vector<1x512xf32> to vector<8x512xf32>
    %36 = arith.addf %33, %35 : vector<8x512xf32>
    %cst_18 = arith.constant 0.000000e+00 : f32
    %37 = vector.broadcast %cst_18 : f32 to vector<8x512xf32>
    %38 = arith.maximumf %36, %37 : vector<8x512xf32>
    %cst_19 = arith.constant dense<0.000000e+00> : vector<512xf32>
    %39 = vector.multi_reduction <add>, %38, %cst_19 [0] : vector<8x512xf32> to vector<512xf32>
    %40 = vector.shape_cast %39 : vector<512xf32> to vector<1x512xf32>
    %cst_20 = arith.constant 1.250000e-01 : f32
    %41 = vector.broadcast %cst_20 : f32 to vector<1x512xf32>
    %42 = arith.mulf %40, %41 : vector<1x512xf32>
    %43 = vector.broadcast %42 : vector<1x512xf32> to vector<8x512xf32>
    %44 = arith.subf %38, %43 : vector<8x512xf32>
    %45 = arith.mulf %44, %44 : vector<8x512xf32>
    %cst_21 = arith.constant dense<0.000000e+00> : vector<512xf32>
    %46 = vector.multi_reduction <add>, %45, %cst_21 [0] : vector<8x512xf32> to vector<512xf32>
    %47 = vector.shape_cast %46 : vector<512xf32> to vector<1x512xf32>
    %cst_22 = arith.constant 1.250000e-01 : f32
    %48 = vector.broadcast %cst_22 : f32 to vector<1x512xf32>
    %49 = arith.mulf %47, %48 : vector<1x512xf32>
    %cst_23 = arith.constant 9.99999974E-6 : f32
    %50 = vector.broadcast %cst_23 : f32 to vector<1x512xf32>
    %51 = arith.addf %49, %50 : vector<1x512xf32>
    %52 = math.rsqrt %51 : vector<1x512xf32>
    %c1_24 = arith.constant 1 : index
    %c512_25 = arith.constant 512 : index
    %53 = vector.load %arg4[%c1_24, %c512_25] : memref<3x1152xf32, #tpu.memory_space<vmem>>, vector<1x512xf32>
    %54 = arith.mulf %52, %53 : vector<1x512xf32>
    %55 = vector.broadcast %54 : vector<1x512xf32> to vector<8x512xf32>
    %56 = arith.mulf %44, %55 : vector<8x512xf32>
    %c2_26 = arith.constant 2 : index
    %c512_27 = arith.constant 512 : index
    %57 = vector.load %arg4[%c2_26, %c512_27] : memref<3x1152xf32, #tpu.memory_space<vmem>>, vector<1x512xf32>
    %58 = vector.broadcast %57 : vector<1x512xf32> to vector<8x512xf32>
    %59 = arith.addf %56, %58 : vector<8x512xf32>
    %60 = arith.truncf %59 : vector<8x512xf32> to vector<8x512xbf16>
    %c0_28 = arith.constant 0 : index
    %c512_29 = arith.constant 512 : index
    %61 = vector.load %arg3[%c0_28, %c512_29] : memref<512x640xbf16, #tpu.memory_space<vmem>>, vector<512x128xbf16>
    %cst_30 = arith.constant dense<0.000000e+00> : vector<8x128xf32>
    %62 = tpu.matmul %60, %61, %cst_30 {dimension_numbers = #tpu.dot_dimension_numbers<[1], [0], [0], [1], [0, 0, 1, 1], [], []>} : vector<8x512xbf16>, vector<512x128xbf16>, vector<8x128xf32> -> vector<8x128xf32>
    %c0_31 = arith.constant 0 : index
    %c1024 = arith.constant 1024 : index
    %63 = vector.load %arg4[%c0_31, %c1024] : memref<3x1152xf32, #tpu.memory_space<vmem>>, vector<1x128xf32>
    %64 = vector.broadcast %63 : vector<1x128xf32> to vector<8x128xf32>
    %65 = arith.addf %62, %64 : vector<8x128xf32>
    %c0_32 = arith.constant 0 : index
    %c0_33 = arith.constant 0 : index
    %c0_34 = arith.constant 0 : index
    %66 = vector.load %arg5[%c0_32, %c0_33, %c0_34] : memref<1x8x128xf32, #tpu.memory_space<vmem>>, vector<1x8x128xf32>
    %67 = vector.shape_cast %66 : vector<1x8x128xf32> to vector<8x128xf32>
    %68 = vector.shape_cast %65 : vector<8x128xf32> to vector<1x8x128xf32>
    tpu.vector_store %arg5[%c0_32, %c0_33, %c0_34], %68 {strides = array<i32>} : memref<1x8x128xf32, #tpu.memory_space<vmem>>, vector<1x8x128xf32>,
    return
  }
  func.func @transform_0(%arg0: i32) -> (i32, i32, i32) {
    %c0_i32 = arith.constant 0 : i32
    %c0_i32_0 = arith.constant 0 : i32
    %c0_i32_1 = arith.constant 0 : i32
    return %arg0, %c0_i32, %c0_i32_0 : i32, i32, i32
  }
  func.func @transform_1(%arg0: i32) -> (i32, i32) {
    %c0_i32 = arith.constant 0 : i32
    %c0_i32_0 = arith.constant 0 : i32
    %c0_i32_1 = arith.constant 0 : i32
    return %c0_i32, %c0_i32_0 : i32, i32
  }
  func.func @transform_2(%arg0: i32) -> (i32, i32) {
    %c0_i32 = arith.constant 0 : i32
    %c0_i32_0 = arith.constant 0 : i32
    %c0_i32_1 = arith.constant 0 : i32
    return %c0_i32, %c0_i32_0 : i32, i32
  }
  func.func @transform_3(%arg0: i32) -> (i32, i32) {
    %c0_i32 = arith.constant 0 : i32
    %c0_i32_0 = arith.constant 0 : i32
    %c0_i32_1 = arith.constant 0 : i32
    return %c0_i32, %c0_i32_0 : i32, i32
  }
  func.func @transform_4(%arg0: i32) -> (i32, i32, i32) {
    %c0_i32 = arith.constant 0 : i32
    %c0_i32_0 = arith.constant 0 : i32
    %c0_i32_1 = arith.constant 0 : i32
    return %arg0, %c0_i32, %c0_i32_0 : i32, i32, i32
  }
}

</mosaic_0001>

<bundles_post_ra>
// kernel: tpu_custom_call.1
= control target key start
LH: loop header
LB: loop body
LE: loop exit
PB: predicated region body
PF: predicated region fallthrough
CT: control target
= control target key end

     0   :  { %9 = vsyncpa [#allocation3], 0  ;;  %s2699_s0 = inlined_call_operand.hbm [shape: f32[1,8,64], index: 0, kind: input, shape index: {}]   ;;  %s2700_s1 = inlined_call_operand.hbm [shape: bf16[64,512], index: 1, kind: input, shape index: {}]   ;;  %s2701_s2 = inlined_call_operand.hbm [shape: bf16[512,640], index: 2, kind: input, shape index: {}]   ;;  %s2702_s3 = inlined_call_operand.hbm [shape: f32[3,1152], index: 3, kind: input, shape index: {}]   ;;  %s2703_s4 = inlined_call_operand.hbm [shape: f32[1,8,128], index: 4, kind: output, shape index: {}]  }
   0x1   :  { %10 = vsyncpa [#allocation6], 0 }
   0x2   :  { %11 = vsyncpa [#allocation9], 0 }
   0x3   :  { %12 = vsyncpa [#allocation4], 0  ;;  %s2525_s15 = smov [#allocation5]   ;;  %s2407_s19 = scalar_lea.hbm %s2700_s1, 2048 }
   0x4   :  { %s28_s16 = sshll.u32 %s2525_s15, 4  ;;  %p2408_p0 = scmp.ne.s32.totalorder %s2700_s1, %s2407_s19  ;;  %s29_s16 = int_to_ptr.vmem [resolvable:$true] %s28_s16 }
   0x5   :  { %p2411_p1 = scmp.lt.u32.totalorder %s2407_s19, %s2700_s1 }
   0x7   :  { %p2413_p2 = pnand %p2411_p1, %p2408_p0 }
   0x9   :  { %2416 = shalt.err (!%p2413_p2)
}
   0xa   :  { %s2417_s24 = scalar_lea.vmem %s29_s16, 2048  ;;  %p2422_p4 = scmp.lt.s32.totalorder %s29_s16, %s29_s16 }
   0xb   :  { %p2418_p3 = scmp.ne.s32.totalorder %s29_s16, %s2417_s24  ;;  %p2423_p5 = scmp.lt.s32.totalorder %s2417_s24, %s2417_s24 }
   0xd   :  { %p2424_p6 = por %p2423_p5, %p2422_p4 }
   0xf   :  { %p2425_p7 = pnand %p2424_p6, %p2418_p3 }
  0x11   :  { %2428 = shalt.err (!%p2425_p7)
}
  0x12   :  { %s2526_s25 = smov 256   ;;  %s2527_s26 = smov 16  }
  0x13   :  { %34 = dma.hbm_to_vmem [thread:$0]  %s2700_s1, 2048, %s29_s16, [#allocation6], %s2526_s25, %s2526_s25, %s2527_s26  }
  0x14   :  { %s2528_s29 = smov [#allocation2]   ;;  %s2529_s5 = smov [#allocation7]  }
  0x15   :  { %s19_s30 = sshll.u32 %s2528_s29, 4  ;;  %s40_s6 = sshll.u32 %s2529_s5, 4  ;;  %s20_s30 = int_to_ptr.vmem [resolvable:$true] %s19_s30  ;;  %s41_s6 = int_to_ptr.vmem [resolvable:$true] %s40_s6 }
  0x16   :  { %s2429_s9 = scalar_lea.hbm %s2699_s0, 128 }
  0x17   :  { %p2430_p8 = scmp.ne.s32.totalorder %s2699_s0, %s2429_s9  ;;  %p2433_p9 = scmp.lt.u32.totalorder %s2429_s9, %s2699_s0 }
  0x19   :  { %p2435_p10 = pnand %p2433_p9, %p2430_p8 }
  0x1b   :  { %2438 = shalt.err (!%p2435_p10)
}
  0x1c   :  { %s2439_s1 = scalar_lea.vmem %s20_s30, 128  ;;  %p2444_p12 = scmp.lt.s32.totalorder %s20_s30, %s20_s30 }
  0x1d   :  { %p2440_p11 = scmp.ne.s32.totalorder %s20_s30, %s2439_s1  ;;  %p2445_p13 = scmp.lt.s32.totalorder %s2439_s1, %s2439_s1 }
  0x1f   :  { %p2446_p0 = por %p2445_p13, %p2444_p12 }
  0x21   :  { %p2447_p1 = pnand %p2446_p0, %p2440_p11 }
  0x23   :  { %2450 = shalt.err (!%p2447_p1)
}
  0x24   :  { %22 = dma.hbm_to_vmem [thread:$0]  %s2699_s0, 128, %s20_s30, [#allocation3]  }
  0x25   :  { %s2451_s18 = scalar_lea.hbm %s2701_s2, 20480 }
  0x26   :  { %p2452_p2 = scmp.ne.s32.totalorder %s2701_s2, %s2451_s18  ;;  %p2455_p3 = scmp.lt.u32.totalorder %s2451_s18, %s2701_s2 }
  0x28   :  { %p2457_p4 = pnand %p2455_p3, %p2452_p2 }
  0x2a   :  { %2460 = shalt.err (!%p2457_p4)
}
  0x2b   :  { %s2461_s23 = scalar_lea.vmem %s41_s6, 20480  ;;  %p2466_p6 = scmp.lt.s32.totalorder %s41_s6, %s41_s6 }
  0x2c   :  { %p2462_p5 = scmp.ne.s32.totalorder %s41_s6, %s2461_s23  ;;  %p2467_p7 = scmp.lt.s32.totalorder %s2461_s23, %s2461_s23 }
  0x2e   :  { %p2468_p8 = por %p2467_p7, %p2466_p6 }
  0x30   :  { %p2469_p9 = pnand %p2468_p8, %p2462_p5 }
  0x32   :  { %2472 = shalt.err (!%p2469_p9)
}
  0x33   :  { %s2530_s0 = smov 320   ;;  %s2531_s24 = smov 20  }
  0x34   :  { %46 = dma.hbm_to_vmem [thread:$0]  %s2701_s2, 20480, %s41_s6, [#allocation6], %s2530_s0, %s2530_s0, %s2531_s24  }
  0x35   :  { %s2532_s27 = smov [#allocation8]   ;;  %s2473_s5 = scalar_lea.hbm %s2702_s3, 576 }
  0x36   :  { %s53_s28 = sshll.u32 %s2532_s27, 4  ;;  %p2474_p10 = scmp.ne.s32.totalorder %s2702_s3, %s2473_s5  ;;  %s54_s28 = int_to_ptr.vmem [resolvable:$true] %s53_s28 }
  0x37   :  { %p2477_p11 = scmp.lt.u32.totalorder %s2473_s5, %s2702_s3 }
  0x39   :  { %p2479_p12 = pnand %p2477_p11, %p2474_p10 }
  0x3b   :  { %2482 = shalt.err (!%p2479_p12)
}
  0x3c   :  { %s2483_s11 = scalar_lea.vmem %s54_s28, 576  ;;  %p2488_p0 = scmp.lt.s32.totalorder %s54_s28, %s54_s28 }
  0x3d   :  { %p2484_p13 = scmp.ne.s32.totalorder %s54_s28, %s2483_s11  ;;  %p2489_p1 = scmp.lt.s32.totalorder %s2483_s11, %s2483_s11 }
  0x3f   :  { %p2490_p2 = por %p2489_p1, %p2488_p0 }
  0x41   :  { %p2491_p3 = pnand %p2490_p2, %p2484_p13 }
  0x43   :  { %2494 = shalt.err (!%p2491_p3)
}
  0x44   :  { %56 = dma.hbm_to_vmem [thread:$0]  %s2702_s3, 576, %s54_s28, [#allocation9]  }
  0x45   :  { %2517 = dma.done.wait [#allocation3], 128  }
  0x46   :  { %2518 = vsyncadd [#allocation3], 4294967168 }
  0x47   :  { %2519 = dma.done.wait [#allocation6], 22528  }
  0x48   :  { %2520 = vsyncadd [#allocation6], 4294944768 }
  0x49   :  { %2521 = dma.done.wait [#allocation9], 576  }
  0x4a   :  { %2522 = vsyncadd [#allocation9], 4294966720  ;;  %v2533_v0 = vmov 0   ;;  %v2143_v1 = vld [vmem:[#allocation5 + $0x4] ss:$16 sps:$4 sm:$0xff]   ;;  %v70_v14 = vld [vmem:[#allocation2] sm:$0xff] }
  0x4b   :  { %226 = vmatprep.mubr.bf16.mxu0 %v2533_v0  ;;  %267 = vmatprep.mubr.bf16.mxu1 %v2533_v0  ;;  %v2145_v2 = vld [vmem:[#allocation5] ss:$16 sps:$4 sm:$0xff]   ;;  %v2146_v3 = vld [vmem:[#allocation5 + $0x24] ss:$16 sps:$4 sm:$0xff]   ;;  %v2155_v7 = vld [vmem:[#allocation5 + $0xc] ss:$16 sps:$4 sm:$0xff]   ;;  %v71_v18 = vpack.c.bf16 %v70_v14, %v70_v14 }
  0x4c   :  { %194 = vmatprep.subr.bf16.mxu0 %v2143_v1  ;;  %v2148_v4 = vld [vmem:[#allocation5 + $0x20] ss:$16 sps:$4 sm:$0xff]   ;;  %v2149_v5 = vld [vmem:[#allocation5 + $0x44] ss:$16 sps:$4 sm:$0xff]   ;;  %v2157_v8 = vld [vmem:[#allocation5 + $0x8] ss:$16 sps:$4 sm:$0xff]   ;;  %235 = vmatprep.subr.bf16.mxu1 %v2155_v7 }
  0x4d   :  { %195 = vmatpush1.bf16.msra.mxu0 %v2145_v2  ;;  %v2151_v6 = vld [vmem:[#allocation5 + $0x40] ss:$16 sps:$4 sm:$0xff]   ;;  %v2158_v9 = vld [vmem:[#allocation5 + $0x2c] ss:$16 sps:$4 sm:$0xff]   ;;  %v2152_v10 = vld [vmem:[#allocation5 + $0x64] ss:$16 sps:$4 sm:$0xff]   ;;  %236 = vmatpush1.bf16.msra.mxu1 %v2157_v8 }
  0x4e   :  { %196 = vmatprep.subr.bf16.mxu0 %v2146_v3  ;;  %v2160_v11 = vld [vmem:[#allocation5 + $0x28] ss:$16 sps:$4 sm:$0xff]   ;;  %v2154_v12 = vld [vmem:[#allocation5 + $0x60] ss:$16 sps:$4 sm:$0xff]   ;;  %237 = vmatprep.subr.bf16.mxu1 %v2158_v9  ;;  %v2161_v13 = vld [vmem:[#allocation5 + $0x4c] ss:$16 sps:$4 sm:$0xff]  }
  0x4f   :  { %v2169_v15 = vld [vmem:[#allocation7 + $0x4] ss:$20 sps:$4 sm:$0xff]   ;;  %v2164_v17 = vld [vmem:[#allocation5 + $0x6c] ss:$16 sps:$4 sm:$0xff]   ;;  %v2167_v19 = vld [vmem:[#allocation7] ss:$20 sps:$4 sm:$0xff]  }
  0x50   :  { %v2163_v16 = vld [vmem:[#allocation5 + $0x48] ss:$16 sps:$4 sm:$0xff]   ;;  %vm190_vm0 = vcmask 523264   ;;  %v2172_v21 = vld [vmem:[#allocation7 + $0xc] ss:$20 sps:$4 sm:$0xff]   ;;  %s2534_s3 = smov [#allocation10]  }
  0x51   :  { %197 = vmatpush1.bf16.msra.mxu0 %v2148_v4  ;;  %238 = vmatpush1.bf16.msra.mxu1 %v2160_v11  ;;  %v2166_v20 = vld [vmem:[#allocation5 + $0x68] ss:$16 sps:$4 sm:$0xff]   ;;  %v2175_v23 = vld [vmem:[#allocation7 + $0x2c] ss:$20 sps:$4 sm:$0xff]   ;;  %v2176_v26 = vld [vmem:[#allocation7 + $0x30] ss:$20 sps:$4 sm:$0xff]  }
  0x52   :  { %198 = vmatprep.subr.bf16.mxu0 %v2149_v5  ;;  %239 = vmatprep.subr.bf16.mxu1 %v2161_v13  ;;  %v2170_v22 = vld [vmem:[#allocation7 + $0x8] ss:$20 sps:$4 sm:$0xff]   ;;  %v2179_v29 = vld [vmem:[#allocation7 + $0x50] ss:$20 sps:$4 sm:$0xff]   ;;  %v2182_v30 = vld [vmem:[#allocation7 + $0x58] ss:$20 sps:$4 sm:$0xff]  }
  0x53   :  { %v2178_v24 = vld [vmem:[#allocation7 + $0x34] ss:$20 sps:$4 sm:$0xff]   ;;  %v2184_v28 = vld [vmem:[#allocation7 + $0x5c] ss:$20 sps:$4 sm:$0xff]   ;;  %v2190_v32 = vld [vmem:[#allocation7 + $0x84] ss:$20 sps:$4 sm:$0xff]  }
  0x54   :  { %v2173_v25 = vld [vmem:[#allocation7 + $0x28] ss:$20 sps:$4 sm:$0xff]   ;;  %v2185_v33 = vld [vmem:[#allocation7 + $0x78] ss:$20 sps:$4 sm:$0xff]   ;;  %v2188_v34 = vld [vmem:[#allocation7 + $0x80] ss:$20 sps:$4 sm:$0xff]  }
  0x55   :  { %199 = vmatpush1.bf16.msra.mxu0 %v2151_v6  ;;  %240 = vmatpush1.bf16.msra.mxu1 %v2163_v16  ;;  %v2181_v27 = vld [vmem:[#allocation7 + $0x54] ss:$20 sps:$4 sm:$0xff]   ;;  %v2187_v31 = vld [vmem:[#allocation7 + $0x7c] ss:$20 sps:$4 sm:$0xff]   ;;  %v2193_v35 = vld [vmem:[#allocation7 + $0xa4] ss:$20 sps:$4 sm:$0xff]  }
  0x56   :  { %200 = vmatprep.subr.bf16.mxu0 %v2152_v10  ;;  %241 = vmatprep.subr.bf16.mxu1 %v2164_v17  ;;  %v2196_v36 = vld [vmem:[#allocation7 + $0xac] ss:$20 sps:$4 sm:$0xff]   ;;  %v2194_v38 = vld [vmem:[#allocation7 + $0xa8] ss:$20 sps:$4 sm:$0xff]   ;;  %v2200_v42 = vld [vmem:[#allocation7 + $0xd0] ss:$20 sps:$4 sm:$0xff]  }
  0x57   :  { %v2191_v37 = vld [vmem:[#allocation7 + $0xa0] ss:$20 sps:$4 sm:$0xff]   ;;  %v2197_v41 = vld [vmem:[#allocation7 + $0xc8] ss:$20 sps:$4 sm:$0xff]   ;;  %v2203_v45 = vld [vmem:[#allocation7 + $0xf0] ss:$20 sps:$4 sm:$0xff]  }
  0x58   :  { %v2199_v39 = vld [vmem:[#allocation7 + $0xcc] ss:$20 sps:$4 sm:$0xff]   ;;  %v2202_v40 = vld [vmem:[#allocation7 + $0xd4] ss:$20 sps:$4 sm:$0xff]   ;;  %v2208_v44 = vld [vmem:[#allocation7 + $0xfc] ss:$20 sps:$4 sm:$0xff]  }
  0x59   :  { %201 = vmatpush1.bf16.msra.mxu0 %v2154_v12  ;;  %242 = vmatpush1.bf16.msra.mxu1 %v2166_v20  ;;  %v2205_v43 = vld [vmem:[#allocation7 + $0xf4] ss:$20 sps:$4 sm:$0xff]   ;;  %v2206_v46 = vld [vmem:[#allocation7 + $0xf8] ss:$20 sps:$4 sm:$0xff]   ;;  %v2211_v47 = vld [vmem:[#allocation7 + $0x11c] ss:$20 sps:$4 sm:$0xff]  }
  0x5a   :  { %1221 = vmatprep.subr.bf16.mxu0 %v2169_v15  ;;  %1303 = vmatprep.subr.bf16.mxu1 %v2172_v21  ;;  %v2214_v48 = vld [vmem:[#allocation7 + $0x124] ss:$20 sps:$4 sm:$0xff]   ;;  %v2212_v50 = vld [vmem:[#allocation7 + $0x120] ss:$20 sps:$4 sm:$0xff]   ;;  %v2218_v54 = vld [vmem:[#allocation7 + $0x148] ss:$20 sps:$4 sm:$0xff]   ;;  %v90_v21 = vlaneseq }
  0x5b   :  { %v2209_v49 = vld [vmem:[#allocation7 + $0x118] ss:$20 sps:$4 sm:$0xff]   ;;  %v2215_v53 = vld [vmem:[#allocation7 + $0x140] ss:$20 sps:$4 sm:$0xff]   ;;  %v2221_v57 = vld [vmem:[#allocation7 + $0x168] ss:$20 sps:$4 sm:$0xff]  }
  0x5c   :  { %1914 = vmatmul.mubr.msk.bf16.vlgmr.msra.gmra.mrb[0].mxu0 %vm190_vm0, %v71_v18  ;;  %1915 = vmatmul.mubr.msk.bf16.vlgmr.msra.gmra.mrb[0].mxu1 %vm190_vm0, %v71_v18  ;;  %v2217_v51 = vld [vmem:[#allocation7 + $0x144] ss:$20 sps:$4 sm:$0xff]   ;;  %v2220_v52 = vld [vmem:[#allocation7 + $0x14c] ss:$20 sps:$4 sm:$0xff]   ;;  %v2226_v56 = vld [vmem:[#allocation7 + $0x174] ss:$20 sps:$4 sm:$0xff]  }
  0x5d   :  { %1222 = vmatpush1.bf16.msra.mxu0 %v2167_v19  ;;  %1304 = vmatpush1.bf16.msra.mxu1 %v2170_v22  ;;  %v2223_v55 = vld [vmem:[#allocation7 + $0x16c] ss:$20 sps:$4 sm:$0xff]   ;;  %v2224_v58 = vld [vmem:[#allocation7 + $0x170] ss:$20 sps:$4 sm:$0xff]   ;;  %v2229_v59 = vld [vmem:[#allocation7 + $0x194] ss:$20 sps:$4 sm:$0xff]  }
  0x5e   :  { %1223 = vmatprep.subr.bf16.mxu0 %v2175_v23  ;;  %1305 = vmatprep.subr.bf16.mxu1 %v2178_v24  ;;  %v2232_v60 = vld [vmem:[#allocation7 + $0x19c] ss:$20 sps:$4 sm:$0xff]   ;;  %v2230_v62 = vld [vmem:[#allocation7 + $0x198] ss:$20 sps:$4 sm:$0xff]   ;;  %v2236_v1 = vld [vmem:[#allocation7 + $0x1c0] ss:$20 sps:$4 sm:$0xff]  }
  0x5f   :  { %v2227_v61 = vld [vmem:[#allocation7 + $0x190] ss:$20 sps:$4 sm:$0xff]   ;;  %v2233_v0 = vld [vmem:[#allocation7 + $0x1b8] ss:$20 sps:$4 sm:$0xff]   ;;  %v2239_v5 = vld [vmem:[#allocation7 + $0x1e0] ss:$20 sps:$4 sm:$0xff]  }
  0x60   :  { %v2235_v63 = vld [vmem:[#allocation7 + $0x1bc] ss:$20 sps:$4 sm:$0xff]   ;;  %v2238_v2 = vld [vmem:[#allocation7 + $0x1c4] ss:$20 sps:$4 sm:$0xff]   ;;  %v2244_v4 = vld [vmem:[#allocation7 + $0x1ec] ss:$20 sps:$4 sm:$0xff]  }
  0x61   :  { %1224 = vmatpush1.bf16.msra.mxu0 %v2173_v25  ;;  %1306 = vmatpush1.bf16.msra.mxu1 %v2176_v26  ;;  %v2241_v3 = vld [vmem:[#allocation7 + $0x1e4] ss:$20 sps:$4 sm:$0xff]   ;;  %v2242_v6 = vld [vmem:[#allocation7 + $0x1e8] ss:$20 sps:$4 sm:$0xff]   ;;  %v2247_v7 = vld [vmem:[#allocation7 + $0x20c] ss:$20 sps:$4 sm:$0xff]  }
  0x62   :  { %1225 = vmatprep.subr.bf16.mxu0 %v2181_v27  ;;  %1307 = vmatprep.subr.bf16.mxu1 %v2184_v28  ;;  %v2250_v8 = vld [vmem:[#allocation7 + $0x214] ss:$20 sps:$4 sm:$0xff]   ;;  %v2248_v10 = vld [vmem:[#allocation7 + $0x210] ss:$20 sps:$4 sm:$0xff]   ;;  %v2254_v14 = vld [vmem:[#allocation7 + $0x238] ss:$20 sps:$4 sm:$0xff]  }
  0x63   :  { %v2245_v9 = vld [vmem:[#allocation7 + $0x208] ss:$20 sps:$4 sm:$0xff]   ;;  %v2251_v13 = vld [vmem:[#allocation7 + $0x230] ss:$20 sps:$4 sm:$0xff]   ;;  %v2257_v17 = vld [vmem:[#allocation7 + $0x258] ss:$20 sps:$4 sm:$0xff]  }
  0x64   :  { %v2253_v11 = vld [vmem:[#allocation7 + $0x234] ss:$20 sps:$4 sm:$0xff]   ;;  %v2256_v12 = vld [vmem:[#allocation7 + $0x23c] ss:$20 sps:$4 sm:$0xff]   ;;  %v2262_v16 = vld [vmem:[#allocation7 + $0x264] ss:$20 sps:$4 sm:$0xff]  }
  0x65   :  { %1226 = vmatpush1.bf16.msra.mxu0 %v2179_v29  ;;  %1308 = vmatpush1.bf16.msra.mxu1 %v2182_v30  ;;  %v2259_v15 = vld [vmem:[#allocation7 + $0x25c] ss:$20 sps:$4 sm:$0xff]   ;;  %v2260_v18 = vld [vmem:[#allocation7 + $0x260] ss:$20 sps:$4 sm:$0xff]   ;;  %v2265_v19 = vld [vmem:[#allocation7 + $0x284] ss:$20 sps:$4 sm:$0xff]  }
  0x66   :  { %1227 = vmatprep.subr.bf16.mxu0 %v2187_v31  ;;  %1309 = vmatprep.subr.bf16.mxu1 %v2190_v32  ;;  %v2268_v20 = vld [vmem:[#allocation7 + $0x28c] ss:$20 sps:$4 sm:$0xff]   ;;  %v91_v22 = vshrl.u32 %v90_v21, 7  ;;  %s1887_s12 = sshll.u32 %s2534_s3, 4  ;;  %s1888_s12 = int_to_ptr.vmem [resolvable:$true] %s1887_s12 }
  0x67   :  { %v88_v24 = vld [vmem:[#allocation8] ss:$4 sm:$0xf]  ;;  %s2495_s13 = scalar_lea.vmem %s1888_s12, 128  ;;  %p2500_p5 = scmp.lt.s32.totalorder %s1888_s12, %s1888_s12 }
  0x68   :  { %v2608_v23 = vsub.s32 0, %v91_v22  ;;  %v2610_v25 = vsub.s32 1, %v91_v22  ;;  %v2614_v28 = vsub.s32 2, %v91_v22  ;;  %v2616_v30 = vsub.s32 3, %v91_v22  ;;  %p2496_p4 = scmp.ne.s32.totalorder %s1888_s12, %s2495_s13  ;;  %p2501_p6 = scmp.lt.s32.totalorder %s2495_s13, %s2495_s13 }
  0x69   :  { %1228 = vmatpush1.bf16.msra.mxu0 %v2185_v33  ;;  %1310 = vmatpush1.bf16.msra.mxu1 %v2188_v34 }
  0x6a   :  { %1229 = vmatprep.subr.bf16.mxu0 %v2193_v35  ;;  %1311 = vmatprep.subr.bf16.mxu1 %v2196_v36  ;;  %v93_v26 = vrot.slane %v88_v24, %v2608_v23  ;;  %v97_v27 = vrot.slane %v88_v24, %v2610_v25  ;;  %p2502_p7 = por %p2501_p6, %p2500_p5 }
  0x6c   :  { %p2503_p8 = pnand %p2502_p7, %p2496_p4 }
  0x6d   :  { %1230 = vmatpush1.bf16.msra.mxu0 %v2191_v37  ;;  %1312 = vmatpush1.bf16.msra.mxu1 %v2194_v38  ;;  %v101_v37 = vrot.slane %v88_v24, %v2614_v28 }
  0x6e   :  { %1231 = vmatprep.subr.bf16.mxu0 %v2199_v39  ;;  %1313 = vmatprep.subr.bf16.mxu1 %v2202_v40  ;;  %v105_v39 = vrot.slane %v88_v24, %v2616_v30 }
  0x71   :  { %1232 = vmatpush1.bf16.msra.mxu0 %v2197_v41  ;;  %1314 = vmatpush1.bf16.msra.mxu1 %v2200_v42 }
  0x72   :  { %1233 = vmatprep.subr.bf16.mxu0 %v2205_v43  ;;  %1315 = vmatprep.subr.bf16.mxu1 %v2208_v44 }
  0x75   :  { %1234 = vmatpush1.bf16.msra.mxu0 %v2203_v45  ;;  %1316 = vmatpush1.bf16.msra.mxu1 %v2206_v46 }
  0x76   :  { %1235 = vmatprep.subr.bf16.mxu0 %v2211_v47  ;;  %1317 = vmatprep.subr.bf16.mxu1 %v2214_v48 }
  0x79   :  { %1236 = vmatpush1.bf16.msra.mxu0 %v2209_v49  ;;  %1318 = vmatpush1.bf16.msra.mxu1 %v2212_v50 }
  0x7a   :  { %1237 = vmatprep.subr.bf16.mxu0 %v2217_v51  ;;  %1319 = vmatprep.subr.bf16.mxu1 %v2220_v52 }
  0x7d   :  { %1238 = vmatpush1.bf16.msra.mxu0 %v2215_v53  ;;  %1320 = vmatpush1.bf16.msra.mxu1 %v2218_v54 }
  0x7e   :  { %1239 = vmatprep.subr.bf16.mxu0 %v2223_v55  ;;  %1321 = vmatprep.subr.bf16.mxu1 %v2226_v56 }
  0x81   :  { %1240 = vmatpush1.bf16.msra.mxu0 %v2221_v57  ;;  %1322 = vmatpush1.bf16.msra.mxu1 %v2224_v58 }
  0x82   :  { %1241 = vmatprep.subr.bf16.mxu0 %v2229_v59  ;;  %1323 = vmatprep.subr.bf16.mxu1 %v2232_v60 }
  0x85   :  { %1242 = vmatpush1.bf16.msra.mxu0 %v2227_v61  ;;  %1324 = vmatpush1.bf16.msra.mxu1 %v2230_v62 }
  0x86   :  { %1243 = vmatprep.subr.bf16.mxu0 %v2235_v63  ;;  %1325 = vmatprep.subr.bf16.mxu1 %v2238_v2 }
  0x89   :  { %1244 = vmatpush1.bf16.msra.mxu0 %v2233_v0  ;;  %1326 = vmatpush1.bf16.msra.mxu1 %v2236_v1 }
  0x8a   :  { %1245 = vmatprep.subr.bf16.mxu0 %v2241_v3  ;;  %1327 = vmatprep.subr.bf16.mxu1 %v2244_v4 }
  0x8d   :  { %1246 = vmatpush1.bf16.msra.mxu0 %v2239_v5  ;;  %1328 = vmatpush1.bf16.msra.mxu1 %v2242_v6 }
  0x8e   :  { %1247 = vmatprep.subr.bf16.mxu0 %v2247_v7  ;;  %1329 = vmatprep.subr.bf16.mxu1 %v2250_v8 }
  0x91   :  { %1248 = vmatpush1.bf16.msra.mxu0 %v2245_v9  ;;  %1330 = vmatpush1.bf16.msra.mxu1 %v2248_v10 }
  0x92   :  { %1249 = vmatprep.subr.bf16.mxu0 %v2253_v11  ;;  %1331 = vmatprep.subr.bf16.mxu1 %v2256_v12 }
  0x95   :  { %1250 = vmatpush1.bf16.msra.mxu0 %v2251_v13  ;;  %1332 = vmatpush1.bf16.msra.mxu1 %v2254_v14 }
  0x96   :  { %1251 = vmatprep.subr.bf16.mxu0 %v2259_v15  ;;  %1333 = vmatprep.subr.bf16.mxu1 %v2262_v16 }
  0x99   :  { %1252 = vmatpush1.bf16.msra.mxu0 %v2257_v17  ;;  %1334 = vmatpush1.bf16.msra.mxu1 %v2260_v18 }
  0x9a   :  { %1262 = vmatprep.subr.bf16.mxu0 %v2265_v19  ;;  %1344 = vmatprep.subr.bf16.mxu1 %v2268_v20 }
 0x12f   :  { %v228_v29 = vpop.f32.mrb[0].mxu0  ;;  %v269_v42 = vpop.f32.mrb[0].mxu1 }
 0x130   :  { %v229_v31 = vadd.f32 %v228_v29, %v93_v26  ;;  %v230_v32 = vpop.f32.mrb[1].mxu0  ;;  %v270_v44 = vadd.f32 %v269_v42, %v101_v37  ;;  %v271_v45 = vpop.f32.mrb[1].mxu1 }
 0x131   :  { %v231_v33 = vadd.f32 %v230_v32, %v97_v27  ;;  %v232_v34 = vpop.f32.mrb[2].mxu0  ;;  %v272_v47 = vadd.f32 %v271_v45, %v105_v39  ;;  %v273_v48 = vpop.f32.mrb[2].mxu1 }
 0x132   :  { %v276_v35 = vmax.f32 %v229_v31, 0.0  ;;  %v233_v36 = vpop.f32.mrb[3].mxu0  ;;  %v278_v50 = vmax.f32 %v270_v44, 0.0  ;;  %v274_v51 = vpop.f32.mrb[3].mxu1 }
 0x133   :  { %v277_v38 = vmax.f32 %v231_v33, 0.0  ;;  %v279_v53 = vmax.f32 %v272_v47, 0.0 }
 0x134   :  { %v280_v40 = vrot.slane %v276_v35, 4  ;;  %v292_v55 = vrot.slane %v278_v50, 4 }
 0x135   :  { %v286_v41 = vrot.slane %v277_v38, 4  ;;  %v298_v57 = vrot.slane %v279_v53, 4 }
 0x136   :  { %v281_v43 = vadd.f32 %v280_v40, %v276_v35  ;;  %v293_v59 = vadd.f32 %v292_v55, %v278_v50 }
 0x137   :  { %v287_v46 = vadd.f32 %v286_v41, %v277_v38  ;;  %v299_v61 = vadd.f32 %v298_v57, %v279_v53 }
 0x138   :  { %v282_v49 = vrot.slane %v281_v43, 2  ;;  %v294_v63 = vrot.slane %v293_v59, 2 }
 0x139   :  { %v288_v52 = vrot.slane %v287_v46, 2  ;;  %v300_v1 = vrot.slane %v299_v61, 2 }
 0x13a   :  { %v283_v54 = vadd.f32 %v282_v49, %v281_v43  ;;  %v295_v3 = vadd.f32 %v294_v63, %v293_v59 }
 0x13b   :  { %v289_v56 = vadd.f32 %v288_v52, %v287_v46  ;;  %v301_v5 = vadd.f32 %v300_v1, %v299_v61 }
 0x13c   :  { %v284_v58 = vrot.slane %v283_v54, 1  ;;  %v296_v7 = vrot.slane %v295_v3, 1 }
 0x13d   :  { %v290_v60 = vrot.slane %v289_v56, 1  ;;  %v302_v9 = vrot.slane %v301_v5, 1 }
 0x13e   :  { %v285_v62 = vadd.f32 %v284_v58, %v283_v54  ;;  %v297_v11 = vadd.f32 %v296_v7, %v295_v3  ;;  %v353_v54 = vld [vmem:[#allocation8 + $0x1] ss:$4 sm:$0xf] }
 0x13f   :  { %v291_v0 = vadd.f32 %v290_v60, %v289_v56  ;;  %v303_v13 = vadd.f32 %v302_v9, %v301_v5  ;;  %v358_v57 = vrot.slane %v353_v54, %v2608_v23  ;;  %v362_v58 = vrot.slane %v353_v54, %v2610_v25  ;;  %v400_v60 = vld [vmem:[#allocation8 + $0x2] ss:$4 sm:$0xf] }
 0x140   :  { %v304_v2 = vmul.f32 0.125, %v285_v62  ;;  %v306_v15 = vmul.f32 0.125, %v297_v11  ;;  %v366_v1 = vrot.slane %v353_v54, %v2614_v28  ;;  %v370_v5 = vrot.slane %v353_v54, %v2616_v30  ;;  %v2302_v54 = vld [vmem:[#allocation7 + $0x378] ss:$20 sps:$4 sm:$0xff]  }
 0x141   :  { %v305_v4 = vmul.f32 0.125, %v291_v0  ;;  %v307_v17 = vmul.f32 0.125, %v303_v13 }
 0x142   :  { %v2620_v6 = vsub.f32 %v276_v35, %v304_v2  ;;  %v2628_v19 = vsub.f32 %v278_v50, %v306_v15  ;;  %v405_v2 = vrot.slane %v400_v60, %v2608_v23 }
 0x143   :  { %v2622_v8 = vsub.f32 %v277_v38, %v305_v4  ;;  %v2630_v21 = vsub.f32 %v279_v53, %v307_v17  ;;  %v409_v4 = vrot.slane %v400_v60, %v2610_v25  ;;  %v413_v17 = vrot.slane %v400_v60, %v2614_v28 }
 0x144   :  { %v312_v10 = vmul.f32 %v2620_v6, %v2620_v6  ;;  %v314_v24 = vmul.f32 %v2628_v19, %v2628_v19 }
 0x145   :  { %v313_v12 = vmul.f32 %v2622_v8, %v2622_v8  ;;  %v315_v27 = vmul.f32 %v2630_v21, %v2630_v21 }
 0x146   :  { %v316_v14 = vrot.slane %v312_v10, 4  ;;  %v328_v31 = vrot.slane %v314_v24, 4 }
 0x147   :  { %v322_v16 = vrot.slane %v313_v12, 4  ;;  %v334_v33 = vrot.slane %v315_v27, 4 }
 0x148   :  { %v317_v18 = vadd.f32 %v316_v14, %v312_v10  ;;  %v329_v35 = vadd.f32 %v328_v31, %v314_v24 }
 0x149   :  { %v323_v20 = vadd.f32 %v322_v16, %v313_v12  ;;  %v335_v37 = vadd.f32 %v334_v33, %v315_v27  ;;  %v2269_v33 = vld [vmem:[#allocation7 + $0x2a8] ss:$20 sps:$4 sm:$0xff]  }
 0x14a   :  { %v318_v22 = vrot.slane %v317_v18, 2  ;;  %v330_v39 = vrot.slane %v329_v35, 2 }
 0x14b   :  { %v324_v26 = vrot.slane %v323_v20, 2  ;;  %v336_v41 = vrot.slane %v335_v37, 2 }
 0x14c   :  { %v319_v29 = vadd.f32 %v318_v22, %v317_v18  ;;  %v331_v43 = vadd.f32 %v330_v39, %v329_v35  ;;  %v2266_v22 = vld [vmem:[#allocation7 + $0x288] ss:$20 sps:$4 sm:$0xff]   ;;  %v2278_v39 = vld [vmem:[#allocation7 + $0x2d8] ss:$20 sps:$4 sm:$0xff]  }
 0x14d   :  { %v325_v32 = vadd.f32 %v324_v26, %v323_v20  ;;  %v337_v45 = vadd.f32 %v336_v41, %v335_v37  ;;  %v2263_v20 = vld [vmem:[#allocation7 + $0x280] ss:$20 sps:$4 sm:$0xff]   ;;  %v417_v26 = vrot.slane %v400_v60, %v2616_v30  ;;  %v2281_v41 = vld [vmem:[#allocation7 + $0x2f8] ss:$20 sps:$4 sm:$0xff]  }
 0x14e   :  { %v320_v34 = vrot.slane %v319_v29, 1  ;;  %v332_v47 = vrot.slane %v331_v43, 1  ;;  %v2316_v60 = vld [vmem:[#allocation7 + $0x3cc] ss:$20 sps:$4 sm:$0xff]  }
 0x14f   :  { %v326_v36 = vrot.slane %v325_v32, 1  ;;  %v338_v49 = vrot.slane %v337_v45, 1 }
 0x150   :  { %v321_v38 = vadd.f32 %v320_v34, %v319_v29  ;;  %v333_v50 = vadd.f32 %v332_v47, %v331_v43  ;;  %v2274_v29 = vld [vmem:[#allocation7 + $0x2b4] ss:$20 sps:$4 sm:$0xff]   ;;  %v2272_v34 = vld [vmem:[#allocation7 + $0x2b0] ss:$20 sps:$4 sm:$0xff]   ;;  %v2295_v47 = vld [vmem:[#allocation7 + $0x34c] ss:$20 sps:$4 sm:$0xff]  }
 0x151   :  { %v327_v40 = vadd.f32 %v326_v36, %v325_v32  ;;  %v339_v51 = vadd.f32 %v338_v49, %v337_v45  ;;  %v2277_v36 = vld [vmem:[#allocation7 + $0x2d4] ss:$20 sps:$4 sm:$0xff]   ;;  %v2289_v43 = vld [vmem:[#allocation7 + $0x324] ss:$20 sps:$4 sm:$0xff]  }
 0x152   :  { %v340_v42 = vmul.f32 0.125, %v321_v38  ;;  %v342_v52 = vmul.f32 0.125, %v333_v50  ;;  %v2275_v38 = vld [vmem:[#allocation7 + $0x2d0] ss:$20 sps:$4 sm:$0xff]   ;;  %v2287_v45 = vld [vmem:[#allocation7 + $0x320] ss:$20 sps:$4 sm:$0xff]  }
 0x153   :  { %v341_v44 = vmul.f32 0.125, %v327_v40  ;;  %v343_v53 = vmul.f32 0.125, %v339_v51  ;;  %v2286_v40 = vld [vmem:[#allocation7 + $0x304] ss:$20 sps:$4 sm:$0xff]   ;;  %v2293_v49 = vld [vmem:[#allocation7 + $0x348] ss:$20 sps:$4 sm:$0xff]  }
 0x154   :  { %v344_v46 = vadd.f32 1e-05, %v340_v42  ;;  %v346_v55 = vadd.f32 1e-05, %v342_v52  ;;  %v2284_v42 = vld [vmem:[#allocation7 + $0x300] ss:$20 sps:$4 sm:$0xff]  }
 0x155   :  { %v345_v48 = vadd.f32 1e-05, %v341_v44  ;;  %v347_v56 = vadd.f32 1e-05, %v343_v53  ;;  %v2292_v44 = vld [vmem:[#allocation7 + $0x32c] ss:$20 sps:$4 sm:$0xff]  }
 0x156   :  { %2391 = vrsqrt.f32 %v344_v46  ;;  %v2290_v46 = vld [vmem:[#allocation7 + $0x328] ss:$20 sps:$4 sm:$0xff]   ;;  %v2296_v50 = vld [vmem:[#allocation7 + $0x350] ss:$20 sps:$4 sm:$0xff]  }
 0x157   :  { %2393 = vrsqrt.f32 %v345_v48  ;;  %v2298_v48 = vld [vmem:[#allocation7 + $0x354] ss:$20 sps:$4 sm:$0xff]   ;;  %v2304_v52 = vld [vmem:[#allocation7 + $0x37c] ss:$20 sps:$4 sm:$0xff]  }
 0x158   :  { %2395 = vrsqrt.f32 %v346_v55  ;;  %v2301_v51 = vld [vmem:[#allocation7 + $0x374] ss:$20 sps:$4 sm:$0xff]   ;;  %v2299_v53 = vld [vmem:[#allocation7 + $0x370] ss:$20 sps:$4 sm:$0xff]  }
 0x159   :  { %2397 = vrsqrt.f32 %v347_v56  ;;  %v2307_v55 = vld [vmem:[#allocation7 + $0x39c] ss:$20 sps:$4 sm:$0xff]   ;;  %v2310_v56 = vld [vmem:[#allocation7 + $0x3a4] ss:$20 sps:$4 sm:$0xff]  }
 0x160   :  { %v2392_v59 = vpop.eup %2391 }
 0x161   :  { %v2394_v61 = vpop.eup %2393  ;;  %v375_v62 = vmul.f32 %v2392_v59, %v358_v57  ;;  %v2305_v57 = vld [vmem:[#allocation7 + $0x398] ss:$20 sps:$4 sm:$0xff]  }
 0x162   :  { %v376_v63 = vmul.f32 %v2394_v61, %v362_v58  ;;  %v2396_v9 = vpop.eup %2395  ;;  %v2308_v58 = vld [vmem:[#allocation7 + $0x3a0] ss:$20 sps:$4 sm:$0xff]   ;;  %v2313_v59 = vld [vmem:[#allocation7 + $0x3c4] ss:$20 sps:$4 sm:$0xff]  }
 0x163   :  { %v382_v0 = vrot.slane %v375_v62, %v2608_v23  ;;  %v2398_v11 = vpop.eup %2397  ;;  %v377_v12 = vmul.f32 %v2396_v9, %v366_v1  ;;  %v2311_v61 = vld [vmem:[#allocation7 + $0x3c0] ss:$20 sps:$4 sm:$0xff]   ;;  %v2314_v62 = vld [vmem:[#allocation7 + $0x3c8] ss:$20 sps:$4 sm:$0xff]  }
 0x164   :  { %v386_v3 = vrot.slane %v376_v63, %v2608_v23  ;;  %v378_v15 = vmul.f32 %v2398_v11, %v370_v5  ;;  %v2319_v63 = vld [vmem:[#allocation7 + $0x3ec] ss:$20 sps:$4 sm:$0xff]   ;;  %v2317_v1 = vld [vmem:[#allocation7 + $0x3e8] ss:$20 sps:$4 sm:$0xff]   ;;  %v2323_v5 = vld [vmem:[#allocation7 + $0x410] ss:$20 sps:$4 sm:$0xff]  }
 0x165   :  { %v395_v7 = vmul.f32 %v382_v0, %v2620_v6  ;;  %v390_v16 = vrot.slane %v377_v12, %v2608_v23  ;;  %v2322_v0 = vld [vmem:[#allocation7 + $0x3f4] ss:$20 sps:$4 sm:$0xff]   ;;  %v2331_v9 = vld [vmem:[#allocation7 + $0x43c] ss:$20 sps:$4 sm:$0xff]   ;;  %v2329_v11 = vld [vmem:[#allocation7 + $0x438] ss:$20 sps:$4 sm:$0xff]  }
 0x166   :  { %v396_v10 = vmul.f32 %v386_v3, %v2622_v8  ;;  %v394_v24 = vrot.slane %v378_v15, %v2608_v23  ;;  %v2271_v8 = vld [vmem:[#allocation7 + $0x2ac] ss:$20 sps:$4 sm:$0xff]   ;;  %v2325_v3 = vld [vmem:[#allocation7 + $0x414] ss:$20 sps:$4 sm:$0xff]  }
 0x167   :  { %v422_v13 = vadd.f32 %v405_v2, %v395_v7  ;;  %v397_v6 = vmul.f32 %v390_v16, %v2628_v19  ;;  %v2280_v19 = vld [vmem:[#allocation7 + $0x2dc] ss:$20 sps:$4 sm:$0xff]   ;;  %v2326_v7 = vld [vmem:[#allocation7 + $0x418] ss:$20 sps:$4 sm:$0xff]   ;;  %v2332_v12 = vld [vmem:[#allocation7 + $0x440] ss:$20 sps:$4 sm:$0xff]  }
 0x168   :  { %v423_v14 = vadd.f32 %v409_v4, %v396_v10  ;;  %v398_v31 = vmul.f32 %v394_v24, %v2630_v21  ;;  %v2283_v21 = vld [vmem:[#allocation7 + $0x2fc] ss:$20 sps:$4 sm:$0xff]   ;;  %v2334_v10 = vld [vmem:[#allocation7 + $0x444] ss:$20 sps:$4 sm:$0xff]   ;;  %v2335_v15 = vld [vmem:[#allocation7 + $0x460] ss:$20 sps:$4 sm:$0xff]  }
 0x169   :  { %v426_v27 = vpack.c.bf16 %v422_v13, %v422_v13  ;;  %v2652_v32 = vadd.f32 %v413_v17, %v397_v6  ;;  %v2320_v2 = vld [vmem:[#allocation7 + $0x3f0] ss:$20 sps:$4 sm:$0xff]   ;;  %v2338_v16 = vld [vmem:[#allocation7 + $0x468] ss:$20 sps:$4 sm:$0xff]   ;;  %v2343_v17 = vld [vmem:[#allocation7 + $0x48c] ss:$20 sps:$4 sm:$0xff]  }
 0x16a   :  { %v427_v18 = vpack.c.bf16 %v423_v14, %v423_v14  ;;  %v425_v35 = vadd.f32 %v417_v26, %v398_v31  ;;  %v2328_v4 = vld [vmem:[#allocation7 + $0x41c] ss:$20 sps:$4 sm:$0xff]   ;;  %v2337_v13 = vld [vmem:[#allocation7 + $0x464] ss:$20 sps:$4 sm:$0xff]   ;;  %v2340_v14 = vld [vmem:[#allocation7 + $0x46c] ss:$20 sps:$4 sm:$0xff]  }
 0x16b   :  { %v2349_v24 = vld [vmem:[#allocation7 + $0x4b4] ss:$20 sps:$4 sm:$0xff]   ;;  %v2352_v26 = vld [vmem:[#allocation7 + $0x4bc] ss:$20 sps:$4 sm:$0xff]   ;;  %v2353_v31 = vld [vmem:[#allocation7 + $0x4d8] ss:$20 sps:$4 sm:$0xff]  }
 0x16c   :  { %1253 = vmatprep.mubr.bf16.mxu0 %v427_v18  ;;  %1335 = vmatprep.mubr.bf16.mxu1 %v427_v18  ;;  %v429_v37 = vpack.c.bf16 %v425_v35, %v425_v35  ;;  %v2346_v18 = vld [vmem:[#allocation7 + $0x494] ss:$20 sps:$4 sm:$0xff]   ;;  %v2347_v6 = vld [vmem:[#allocation7 + $0x4b0] ss:$20 sps:$4 sm:$0xff]  }
 0x16d   :  { %1254 = vmatmul.mubr.bf16.vlgmr.msra.gmra.mrb[4].mxu0 %v426_v27  ;;  %1336 = vmatmul.mubr.bf16.vlgmr.msra.gmra.mrb[4].mxu1 %v426_v27  ;;  %v2350_v27 = vld [vmem:[#allocation7 + $0x4b8] ss:$20 sps:$4 sm:$0xff]   ;;  %v2359_v35 = vld [vmem:[#allocation7 + $0x150] ss:$20 sps:$4 sm:$0xff]  }
 0x16e   :  { %1263 = vmatpush1.bf16.msra.mxu0 %v2263_v20  ;;  %1345 = vmatpush1.bf16.msra.mxu1 %v2266_v22  ;;  %v2341_v20 = vld [vmem:[#allocation7 + $0x488] ss:$20 sps:$4 sm:$0xff]   ;;  %v2344_v22 = vld [vmem:[#allocation7 + $0x490] ss:$20 sps:$4 sm:$0xff]  }
 0x16f   :  { %1264 = vmatprep.subr.bf16.mxu0 %v2271_v8  ;;  %1346 = vmatprep.subr.bf16.mxu1 %v2274_v29  ;;  %v2355_v8 = vld [vmem:[#allocation7 + $0x4dc] ss:$20 sps:$4 sm:$0xff]   ;;  %v2358_v29 = vld [vmem:[#allocation7 + $0x4e4] ss:$20 sps:$4 sm:$0xff]  }
 0x170   :  { %1294 = vmatprep.mubr.bf16.mxu0 %v429_v37  ;;  %1376 = vmatprep.mubr.bf16.mxu1 %v429_v37  ;;  %v2362_v37 = vld [vmem:[#allocation7 + $0x290] ss:$20 sps:$4 sm:$0xff]  }
 0x172   :  { %1265 = vmatpush1.bf16.msra.mxu0 %v2269_v33  ;;  %1347 = vmatpush1.bf16.msra.mxu1 %v2272_v34  ;;  %v2356_v33 = vld [vmem:[#allocation7 + $0x4e0] ss:$20 sps:$4 sm:$0xff]   ;;  %v428_v34 = vpack.c.bf16 %v2652_v32, %v2652_v32 }
 0x173   :  { %1266 = vmatprep.subr.bf16.mxu0 %v2277_v36  ;;  %1348 = vmatprep.subr.bf16.mxu1 %v2280_v19  ;;  %v2360_v36 = vld [vmem:[#allocation7 + $0x3d0] ss:$20 sps:$4 sm:$0xff]   ;;  %v2368_v32 = vld [vmem:[#allocation7 + $0x420] ss:$20 sps:$4 sm:$0xff]  }
 0x174   :  { %v2361_v19 = vld [vmem:[#allocation7 + $0x10] ss:$20 sps:$4 sm:$0xff]  }
 0x176   :  { %1267 = vmatpush1.bf16.msra.mxu0 %v2275_v38  ;;  %1349 = vmatpush1.bf16.msra.mxu1 %v2278_v39  ;;  %v2363_v38 = vld [vmem:[#allocation7 + $0x178] ss:$20 sps:$4 sm:$0xff]  }
 0x177   :  { %1268 = vmatprep.subr.bf16.mxu0 %v2283_v21  ;;  %1350 = vmatprep.subr.bf16.mxu1 %v2286_v40  ;;  %v2364_v39 = vld [vmem:[#allocation7 + $0x3f8] ss:$20 sps:$4 sm:$0xff]  }
 0x178   :  { %v2365_v21 = vld [vmem:[#allocation7 + $0x38] ss:$20 sps:$4 sm:$0xff]  }
 0x179   :  { %v2366_v40 = vld [vmem:[#allocation7 + $0x2b8] ss:$20 sps:$4 sm:$0xff]  }
 0x17a   :  { %1269 = vmatpush1.bf16.msra.mxu0 %v2281_v41  ;;  %1351 = vmatpush1.bf16.msra.mxu1 %v2284_v42  ;;  %v2367_v41 = vld [vmem:[#allocation7 + $0x1a0] ss:$20 sps:$4 sm:$0xff]  }
 0x17b   :  { %1270 = vmatprep.subr.bf16.mxu0 %v2289_v43  ;;  %1352 = vmatprep.subr.bf16.mxu1 %v2292_v44  ;;  %v2369_v42 = vld [vmem:[#allocation7 + $0x60] ss:$20 sps:$4 sm:$0xff]   ;;  %v2371_v44 = vld [vmem:[#allocation7 + $0x1c8] ss:$20 sps:$4 sm:$0xff]  }
 0x17c   :  { %v2370_v43 = vld [vmem:[#allocation7 + $0x2e0] ss:$20 sps:$4 sm:$0xff]  }
 0x17e   :  { %1271 = vmatpush1.bf16.msra.mxu0 %v2287_v45  ;;  %1353 = vmatpush1.bf16.msra.mxu1 %v2290_v46  ;;  %v2372_v45 = vld [vmem:[#allocation7 + $0x448] ss:$20 sps:$4 sm:$0xff]  }
 0x17f   :  { %1272 = vmatprep.subr.bf16.mxu0 %v2295_v47  ;;  %1354 = vmatprep.subr.bf16.mxu1 %v2298_v48  ;;  %v2373_v46 = vld [vmem:[#allocation7 + $0x88] ss:$20 sps:$4 sm:$0xff]   ;;  %v2375_v48 = vld [vmem:[#allocation7 + $0x1f0] ss:$20 sps:$4 sm:$0xff]  }
 0x180   :  { %v2374_v47 = vld [vmem:[#allocation7 + $0x308] ss:$20 sps:$4 sm:$0xff]  }
 0x182   :  { %1273 = vmatpush1.bf16.msra.mxu0 %v2293_v49  ;;  %1355 = vmatpush1.bf16.msra.mxu1 %v2296_v50  ;;  %v2376_v49 = vld [vmem:[#allocation7 + $0x470] ss:$20 sps:$4 sm:$0xff]  }
 0x183   :  { %1274 = vmatprep.subr.bf16.mxu0 %v2301_v51  ;;  %1356 = vmatprep.subr.bf16.mxu1 %v2304_v52  ;;  %v2377_v50 = vld [vmem:[#allocation7 + $0xb0] ss:$20 sps:$4 sm:$0xff]   ;;  %v2379_v52 = vld [vmem:[#allocation7 + $0x218] ss:$20 sps:$4 sm:$0xff]  }
 0x184   :  { %v2378_v51 = vld [vmem:[#allocation7 + $0x330] ss:$20 sps:$4 sm:$0xff]  }
 0x186   :  { %1275 = vmatpush1.bf16.msra.mxu0 %v2299_v53  ;;  %1357 = vmatpush1.bf16.msra.mxu1 %v2302_v54  ;;  %v2380_v53 = vld [vmem:[#allocation7 + $0x498] ss:$20 sps:$4 sm:$0xff]  }
 0x187   :  { %1276 = vmatprep.subr.bf16.mxu0 %v2307_v55  ;;  %1358 = vmatprep.subr.bf16.mxu1 %v2310_v56  ;;  %v2381_v54 = vld [vmem:[#allocation7 + $0xd8] ss:$20 sps:$4 sm:$0xff]   ;;  %v2383_v56 = vld [vmem:[#allocation7 + $0x240] ss:$20 sps:$4 sm:$0xff]  }
 0x188   :  { %v2382_v55 = vld [vmem:[#allocation7 + $0x358] ss:$20 sps:$4 sm:$0xff]  }
 0x18a   :  { %1277 = vmatpush1.bf16.msra.mxu0 %v2305_v57  ;;  %1359 = vmatpush1.bf16.msra.mxu1 %v2308_v58  ;;  %v2384_v57 = vld [vmem:[#allocation7 + $0x4c0] ss:$20 sps:$4 sm:$0xff]  }
 0x18b   :  { %1278 = vmatprep.subr.bf16.mxu0 %v2313_v59  ;;  %1360 = vmatprep.subr.bf16.mxu1 %v2316_v60  ;;  %v2385_v58 = vld [vmem:[#allocation7 + $0x100] ss:$20 sps:$4 sm:$0xff]   ;;  %v2387_v60 = vld [vmem:[#allocation7 + $0x268] ss:$20 sps:$4 sm:$0xff]  }
 0x18c   :  { %v2386_v59 = vld [vmem:[#allocation7 + $0x380] ss:$20 sps:$4 sm:$0xff]  }
 0x18e   :  { %1279 = vmatpush1.bf16.msra.mxu0 %v2311_v61  ;;  %1361 = vmatpush1.bf16.msra.mxu1 %v2314_v62  ;;  %v2388_v61 = vld [vmem:[#allocation7 + $0x4e8] ss:$20 sps:$4 sm:$0xff]  }
 0x18f   :  { %1280 = vmatprep.subr.bf16.mxu0 %v2319_v63  ;;  %1362 = vmatprep.subr.bf16.mxu1 %v2322_v0  ;;  %v2389_v62 = vld [vmem:[#allocation7 + $0x128] ss:$20 sps:$4 sm:$0xff]  }
 0x190   :  { %v2390_v63 = vld [vmem:[#allocation7 + $0x3a8] ss:$20 sps:$4 sm:$0xff]  }
 0x191   :  { %v559_v0 = vld [vmem:[#allocation8 + $0x10] ss:$4 sm:$0xf] }
 0x192   :  { %1281 = vmatpush1.bf16.msra.mxu0 %v2317_v1  ;;  %1363 = vmatpush1.bf16.msra.mxu1 %v2320_v2  ;;  %v564_v1 = vrot.slane %v559_v0, %v2608_v23  ;;  %v572_v2 = vrot.slane %v559_v0, %v2614_v28 }
 0x193   :  { %1282 = vmatprep.subr.bf16.mxu0 %v2325_v3  ;;  %1364 = vmatprep.subr.bf16.mxu1 %v2328_v4  ;;  %v568_v3 = vrot.slane %v559_v0, %v2610_v25  ;;  %v576_v4 = vrot.slane %v559_v0, %v2616_v30 }
 0x196   :  { %1283 = vmatpush1.bf16.msra.mxu0 %v2323_v5  ;;  %1365 = vmatpush1.bf16.msra.mxu1 %v2326_v7 }
 0x197   :  { %1284 = vmatprep.subr.bf16.mxu0 %v2331_v9  ;;  %1366 = vmatprep.subr.bf16.mxu1 %v2334_v10 }
 0x19a   :  { %1285 = vmatpush1.bf16.msra.mxu0 %v2329_v11  ;;  %1367 = vmatpush1.bf16.msra.mxu1 %v2332_v12 }
 0x19b   :  { %1286 = vmatprep.subr.bf16.mxu0 %v2337_v13  ;;  %1368 = vmatprep.subr.bf16.mxu1 %v2340_v14 }
 0x19e   :  { %1287 = vmatpush1.bf16.msra.mxu0 %v2335_v15  ;;  %1369 = vmatpush1.bf16.msra.mxu1 %v2338_v16 }
 0x19f   :  { %1288 = vmatprep.subr.bf16.mxu0 %v2343_v17  ;;  %1370 = vmatprep.subr.bf16.mxu1 %v2346_v18 }
 0x1a2   :  { %1289 = vmatpush1.bf16.msra.mxu0 %v2341_v20  ;;  %1371 = vmatpush1.bf16.msra.mxu1 %v2344_v22 }
 0x1a3   :  { %1290 = vmatprep.subr.bf16.mxu0 %v2349_v24  ;;  %1372 = vmatprep.subr.bf16.mxu1 %v2352_v26 }
 0x1a6   :  { %1291 = vmatpush1.bf16.msra.mxu0 %v2347_v6  ;;  %1373 = vmatpush1.bf16.msra.mxu1 %v2350_v27 }
 0x1a7   :  { %1292 = vmatprep.subr.bf16.mxu0 %v2355_v8  ;;  %1374 = vmatprep.subr.bf16.mxu1 %v2358_v29 }
 0x1aa   :  { %1293 = vmatpush1.bf16.msra.mxu0 %v2353_v31  ;;  %1375 = vmatpush1.bf16.msra.mxu1 %v2356_v33 }
 0x1ab   :  { %2077 = vmatprep.subr.bf16.mxu0 %v2359_v35  ;;  %2099 = vmatprep.subr.bf16.mxu1 %v2360_v36 }
 0x1ad   :  { %1295 = vmatmul.mubr.bf16.vlgmr.msra.gmra.mrb[4].mxu0 %v428_v34  ;;  %1377 = vmatmul.mubr.bf16.vlgmr.msra.gmra.mrb[4].mxu1 %v428_v34 }
 0x1ae   :  { %2078 = vmatpush3.bf16.msra.mxu0 %v2361_v19  ;;  %2100 = vmatpush3.bf16.msra.mxu1 %v2362_v37 }
 0x1af   :  { %2079 = vmatprep.subr.bf16.mxu0 %v2363_v38  ;;  %2101 = vmatprep.subr.bf16.mxu1 %v2364_v39 }
 0x1b2   :  { %2080 = vmatpush3.bf16.msra.mxu0 %v2365_v21  ;;  %2102 = vmatpush3.bf16.msra.mxu1 %v2366_v40 }
 0x1b3   :  { %2081 = vmatprep.subr.bf16.mxu0 %v2367_v41  ;;  %2103 = vmatprep.subr.bf16.mxu1 %v2368_v32 }
 0x1b6   :  { %2082 = vmatpush3.bf16.msra.mxu0 %v2369_v42  ;;  %2104 = vmatpush3.bf16.msra.mxu1 %v2370_v43 }
 0x1b7   :  { %2083 = vmatprep.subr.bf16.mxu0 %v2371_v44  ;;  %2105 = vmatprep.subr.bf16.mxu1 %v2372_v45 }
 0x1ba   :  { %2084 = vmatpush3.bf16.msra.mxu0 %v2373_v46  ;;  %2106 = vmatpush3.bf16.msra.mxu1 %v2374_v47 }
 0x1bb   :  { %2085 = vmatprep.subr.bf16.mxu0 %v2375_v48  ;;  %2107 = vmatprep.subr.bf16.mxu1 %v2376_v49 }
 0x1be   :  { %2086 = vmatpush3.bf16.msra.mxu0 %v2377_v50  ;;  %2108 = vmatpush3.bf16.msra.mxu1 %v2378_v51 }
 0x1bf   :  { %2087 = vmatprep.subr.bf16.mxu0 %v2379_v52  ;;  %2109 = vmatprep.subr.bf16.mxu1 %v2380_v53 }
 0x1c2   :  { %2088 = vmatpush3.bf16.msra.mxu0 %v2381_v54  ;;  %2110 = vmatpush3.bf16.msra.mxu1 %v2382_v55 }
 0x1c3   :  { %2089 = vmatprep.subr.bf16.mxu0 %v2383_v56  ;;  %2111 = vmatprep.subr.bf16.mxu1 %v2384_v57 }
 0x1c6   :  { %2090 = vmatpush3.bf16.msra.mxu0 %v2385_v58  ;;  %2112 = vmatpush3.bf16.msra.mxu1 %v2386_v59 }
 0x1c7   :  { %2091 = vmatprep.subr.bf16.mxu0 %v2387_v60  ;;  %2113 = vmatprep.subr.bf16.mxu1 %v2388_v61 }
 0x1ca   :  { %2092 = vmatpush3.bf16.msra.mxu0 %v2389_v62  ;;  %2114 = vmatpush3.bf16.msra.mxu1 %v2390_v63 }
 0x280   :  { %v1296_v5 = vpop.f32.mrb[4].mxu0  ;;  %v1378_v7 = vpop.f32.mrb[4].mxu1 }
 0x281   :  { %v2121_v9 = vadd.f32 %v1296_v5, %v564_v1  ;;  %v2123_v10 = vadd.f32 %v1378_v7, %v572_v2  ;;  %v1298_v11 = vpop.f32.mrb[5].mxu0  ;;  %v1380_v12 = vpop.f32.mrb[5].mxu1 }
 0x282   :  { %v2122_v13 = vadd.f32 %v1298_v11, %v568_v3  ;;  %v2124_v14 = vadd.f32 %v1380_v12, %v576_v4  ;;  %v1300_v15 = vpop.f32.mrb[6].mxu0  ;;  %v1382_v16 = vpop.f32.mrb[6].mxu1 }
 0x283   :  { %v1385_v17 = vmax.f32 %v2121_v9, 0.0  ;;  %v1387_v18 = vmax.f32 %v2123_v10, 0.0  ;;  %v1301_v20 = vpop.f32.mrb[7].mxu0  ;;  %v1383_v22 = vpop.f32.mrb[7].mxu1 }
 0x284   :  { %v1386_v24 = vmax.f32 %v2122_v13, 0.0  ;;  %v1388_v26 = vmax.f32 %v2124_v14, 0.0 }
 0x285   :  { %v1389_v6 = vrot.slane %v1385_v17, 4  ;;  %v1401_v27 = vrot.slane %v1387_v18, 4 }
 0x286   :  { %v1395_v8 = vrot.slane %v1386_v24, 4  ;;  %v1407_v29 = vrot.slane %v1388_v26, 4 }
 0x287   :  { %v1390_v31 = vadd.f32 %v1389_v6, %v1385_v17  ;;  %v1402_v33 = vadd.f32 %v1401_v27, %v1387_v18 }
 0x288   :  { %v1396_v34 = vadd.f32 %v1395_v8, %v1386_v24  ;;  %v1408_v35 = vadd.f32 %v1407_v29, %v1388_v26 }
 0x289   :  { %v1391_v36 = vrot.slane %v1390_v31, 2  ;;  %v1403_v19 = vrot.slane %v1402_v33, 2 }
 0x28a   :  { %v1397_v37 = vrot.slane %v1396_v34, 2  ;;  %v1409_v38 = vrot.slane %v1408_v35, 2 }
 0x28b   :  { %v1392_v39 = vadd.f32 %v1391_v36, %v1390_v31  ;;  %v1404_v21 = vadd.f32 %v1403_v19, %v1402_v33  ;;  %v1462_v36 = vld [vmem:[#allocation8 + $0x11] ss:$4 sm:$0xf] }
 0x28c   :  { %v1398_v40 = vadd.f32 %v1397_v37, %v1396_v34  ;;  %v1410_v41 = vadd.f32 %v1409_v38, %v1408_v35  ;;  %v1467_v19 = vrot.slane %v1462_v36, %v2608_v23  ;;  %v1475_v37 = vrot.slane %v1462_v36, %v2614_v28 }
 0x28d   :  { %v1393_v32 = vrot.slane %v1392_v39, 1  ;;  %v1405_v42 = vrot.slane %v1404_v21, 1  ;;  %v1471_v38 = vrot.slane %v1462_v36, %v2610_v25 }
 0x28e   :  { %v1399_v43 = vrot.slane %v1398_v40, 1  ;;  %v1411_v44 = vrot.slane %v1410_v41, 1 }
 0x28f   :  { %v1394_v45 = vadd.f32 %v1393_v32, %v1392_v39  ;;  %v1406_v46 = vadd.f32 %v1405_v42, %v1404_v21  ;;  %v1479_v21 = vrot.slane %v1462_v36, %v2616_v30  ;;  %v1509_v32 = vld [vmem:[#allocation8 + $0x12] ss:$4 sm:$0xf] }
 0x290   :  { %v1400_v47 = vadd.f32 %v1399_v43, %v1398_v40  ;;  %v1412_v48 = vadd.f32 %v1411_v44, %v1410_v41 }
 0x291   :  { %v1413_v49 = vmul.f32 0.125, %v1394_v45  ;;  %v1415_v50 = vmul.f32 0.125, %v1406_v46 }
 0x292   :  { %v1414_v51 = vmul.f32 0.125, %v1400_v47  ;;  %v1416_v52 = vmul.f32 0.125, %v1412_v48 }
 0x293   :  { %v1417_v53 = vsub.f32 %v1385_v17, %v1413_v49  ;;  %v2660_v54 = vsub.f32 %v1387_v18, %v1415_v50  ;;  %v1514_v49 = vrot.slane %v1509_v32, %v2608_v23 }
 0x294   :  { %v2662_v55 = vsub.f32 %v1386_v24, %v1414_v51  ;;  %v2664_v56 = vsub.f32 %v1388_v26, %v1416_v52  ;;  %v1518_v52 = vrot.slane %v1509_v32, %v2610_v25 }
 0x295   :  { %v1421_v57 = vmul.f32 %v1417_v53, %v1417_v53  ;;  %v1423_v58 = vmul.f32 %v2660_v54, %v2660_v54 }
 0x296   :  { %v1422_v59 = vmul.f32 %v2662_v55, %v2662_v55  ;;  %v1424_v60 = vmul.f32 %v2664_v56, %v2664_v56 }
 0x297   :  { %v1425_v61 = vrot.slane %v1421_v57, 4  ;;  %v1437_v62 = vrot.slane %v1423_v58, 4 }
 0x298   :  { %v1431_v63 = vrot.slane %v1422_v59, 4  ;;  %v1443_v0 = vrot.slane %v1424_v60, 4 }
 0x299   :  { %v1426_v1 = vadd.f32 %v1425_v61, %v1421_v57  ;;  %v1438_v2 = vadd.f32 %v1437_v62, %v1423_v58  ;;  %v1522_v57 = vrot.slane %v1509_v32, %v2614_v28 }
 0x29a   :  { %v1432_v3 = vadd.f32 %v1431_v63, %v1422_v59  ;;  %v1444_v4 = vadd.f32 %v1443_v0, %v1424_v60  ;;  %v1526_v60 = vrot.slane %v1509_v32, %v2616_v30 }
 0x29b   :  { %v1427_v5 = vrot.slane %v1426_v1, 2  ;;  %v1439_v7 = vrot.slane %v1438_v2, 2 }
 0x29c   :  { %v1433_v9 = vrot.slane %v1432_v3, 2  ;;  %v1445_v10 = vrot.slane %v1444_v4, 2 }
 0x29d   :  { %v1428_v11 = vadd.f32 %v1427_v5, %v1426_v1  ;;  %v1440_v12 = vadd.f32 %v1439_v7, %v1438_v2 }
 0x29e   :  { %v1434_v13 = vadd.f32 %v1433_v9, %v1432_v3  ;;  %v1446_v14 = vadd.f32 %v1445_v10, %v1444_v4 }
 0x29f   :  { %v1429_v15 = vrot.slane %v1428_v11, 1  ;;  %v1441_v16 = vrot.slane %v1440_v12, 1 }
 0x2a0   :  { %v1435_v17 = vrot.slane %v1434_v13, 1  ;;  %v1447_v18 = vrot.slane %v1446_v14, 1 }
 0x2a1   :  { %v1430_v20 = vadd.f32 %v1429_v15, %v1428_v11  ;;  %v1442_v22 = vadd.f32 %v1441_v16, %v1440_v12 }
 0x2a2   :  { %v1436_v24 = vadd.f32 %v1435_v17, %v1434_v13  ;;  %v1448_v26 = vadd.f32 %v1447_v18, %v1446_v14 }
 0x2a3   :  { %v1449_v6 = vmul.f32 0.125, %v1430_v20  ;;  %v1451_v27 = vmul.f32 0.125, %v1442_v22 }
 0x2a4   :  { %v1450_v8 = vmul.f32 0.125, %v1436_v24  ;;  %v1452_v29 = vmul.f32 0.125, %v1448_v26 }
 0x2a5   :  { %v1453_v31 = vadd.f32 1e-05, %v1449_v6  ;;  %v1455_v33 = vadd.f32 1e-05, %v1451_v27 }
 0x2a6   :  { %v1454_v34 = vadd.f32 1e-05, %v1450_v8  ;;  %v1456_v35 = vadd.f32 1e-05, %v1452_v29 }
 0x2a7   :  { %2399 = vrsqrt.f32 %v1453_v31 }
 0x2a8   :  { %2401 = vrsqrt.f32 %v1455_v33 }
 0x2a9   :  { %2403 = vrsqrt.f32 %v1454_v34 }
 0x2aa   :  { %2405 = vrsqrt.f32 %v1456_v35 }
 0x2b1   :  { %v2400_v39 = vpop.eup %2399 }
 0x2b2   :  { %v2402_v40 = vpop.eup %2401  ;;  %v1484_v41 = vmul.f32 %v2400_v39, %v1467_v19 }
 0x2b3   :  { %v2404_v42 = vpop.eup %2403  ;;  %v1486_v43 = vmul.f32 %v2402_v40, %v1475_v37 }
 0x2b4   :  { %v2406_v44 = vpop.eup %2405  ;;  %v1491_v45 = vrot.slane %v1484_v41, %v2608_v23  ;;  %v1485_v46 = vmul.f32 %v2404_v42, %v1471_v38 }
 0x2b5   :  { %v1499_v47 = vrot.slane %v1486_v43, %v2608_v23  ;;  %v1487_v48 = vmul.f32 %v2406_v44, %v1479_v21 }
 0x2b6   :  { %v1504_v50 = vmul.f32 %v1491_v45, %v1417_v53  ;;  %v1495_v51 = vrot.slane %v1485_v46, %v2608_v23 }
 0x2b7   :  { %v1506_v58 = vmul.f32 %v1499_v47, %v2660_v54  ;;  %v1503_v59 = vrot.slane %v1487_v48, %v2608_v23  ;;  %v2044_v54 = vld [vmem:[#allocation8 + $0x20] ss:$0 sm:$0xff] }
 0x2b8   :  { %v1505_v61 = vmul.f32 %v1495_v51, %v2662_v55  ;;  %v1531_v63 = vadd.f32 %v1514_v49, %v1504_v50 }
 0x2b9   :  { %v1507_v62 = vmul.f32 %v1503_v59, %v2664_v56  ;;  %v1533_v1 = vadd.f32 %v1522_v57, %v1506_v58 }
 0x2ba   :  { %v1532_v0 = vadd.f32 %v1518_v52, %v1505_v61  ;;  %v1535_v4 = vpack.c.bf16 %v1531_v63, %v1531_v63 }
 0x2bb   :  { %v1534_v53 = vadd.f32 %v1526_v60, %v1507_v62  ;;  %v1537_v25 = vpack.c.bf16 %v1533_v1, %v1533_v1 }
 0x2bc   :  { %v1536_v2 = vpack.c.bf16 %v1532_v0, %v1532_v0 }
 0x2bd   :  { %v1538_v3 = vpack.c.bf16 %v1534_v53, %v1534_v53 }
 0x2be   :  { %1832 = vmatprep.mubr.bf16.mxu0 %v1536_v2 }
 0x2bf   :  { %1872 = vmatprep.mubr.bf16.mxu1 %v1538_v3  ;;  %1833 = vmatmul.mubr.bf16.vlgmr.msra.gmra.mrb[8].mxu0 %v1535_v4 }
 0x2c0   :  { %1873 = vmatmul.mubr.bf16.vlgmr.msra.gmra.mrb[8].mxu1 %v1537_v25 }
 0x392   :  { %v2093_v28 = vpop.f32.mrb[8].mxu0 }
 0x393   :  { %v2115_v23 = vpop.f32.mrb[8].mxu1  ;;  %v2094_v30 = vpop.f32.mrb[9].mxu0 }
 0x394   :  { %v2095_v5 = vadd.f32 %v2094_v30, %v2093_v28  ;;  %v2116_v55 = vpop.f32.mrb[9].mxu1  ;;  %v2096_v7 = vpop.f32.mrb[10].mxu0 }
 0x395   :  { %v2117_v56 = vadd.f32 %v2116_v55, %v2115_v23  ;;  %v2118_v9 = vpop.f32.mrb[10].mxu1  ;;  %v2097_v10 = vpop.f32.mrb[11].mxu0 }
 0x396   :  { %v1835_v11 = vadd.f32 %v2095_v5, %v2044_v54  ;;  %v2119_v12 = vpop.f32.mrb[11].mxu1 }
 0x398   :  { %v1875_v13 = vadd.f32 %v2117_v56, %v1835_v11 }
 0x39a   :  { %1880 = vst [vmem:[#allocation10] sm:$0xff] %v1875_v13 }
 0x39b   :  { %2506 = shalt.err (!%p2503_p8)
}
 0x39c   :  { %s2507_s15 = scalar_lea.hbm %s2703_s4, 128 }
 0x39d   :  { %p2508_p9 = scmp.ne.s32.totalorder %s2703_s4, %s2507_s15  ;;  %p2511_p10 = scmp.lt.u32.totalorder %s2507_s15, %s2703_s4 }
 0x39f   :  { %p2513_p11 = pnand %p2511_p10, %p2508_p9 }
 0x3a1   :  { %2516 = shalt.err (!%p2513_p11)
}
 0x3a2   :  { %1890 = dma.vmem_to_hbm [thread:$0]  %s1888_s12, 128, %s2703_s4, [#allocation4]  }
 0x3a3   :  { %2523 = dma.done.wait [#allocation4], 128  }
 0x3a4   :  { %2524 = vsyncadd [#allocation4], 4294967168 }
 0x3a5   :  { %1894 = vsyncpa [#allocation3], 1 }
 0x3a6   :  { %1895 = vsyncpa [#allocation6], 1 }
 0x3a7   :  { %1896 = vsyncpa [#allocation9], 1 }
 0x3a8   :  { %1897 = vsyncpa [#allocation4], 1 }

</bundles_post_ra>
